<compile_context>
chip_gen: v5e
topology: v5e:2x2
jax: 0.10.0
libtpu: 0.0.40
codegen_flags: <defaults>
</compile_context>

<pallas_src>
import functools

import jax
import jax.numpy as jnp
from jax import lax
from jax.experimental import pallas as pl
from jax.experimental.pallas import tpu as pltpu


# ---------------------------------------------------------------------------
# Pallas kernel: one scatter-softmax + scatter-add + normalize + residual
# ---------------------------------------------------------------------------

def _hop_kernel(scale, idx_ref, val_ref, key_ref, res_ref, out_ref, acc_ref):
    """Edge-tiled segment attention aggregation.

    Grid: 1-D reduction over edge tiles ("arbitrary").
    idx_ref : (TILE, 1)  int32  segment index per edge (-1 = padding row)
    val_ref : (TILE, D)  f32    values being scattered (entity[tail]/entity[item])
    key_ref : (TILE, D)  f32    attention key (relation / interaction*user)
    res_ref : (NSEG, D)  f32    residual input (constant block across grid)
    out_ref : (NSEG, 2D) f32    packed [normalized emb | res + emb]
    acc_ref : (NSEG, 2D) f32    VMEM scratch [sum(exp*val) | sum(exp)]
    """
    t = pl.program_id(0)

    @pl.when(t == 0)
    def _init():
        acc_ref[...] = jnp.zeros_like(acc_ref)

    idx = idx_ref[...]                                   # (TILE, 1) int32
    val = val_ref[...]                                   # (TILE, D) f32
    key = key_ref[...]                                   # (TILE, D) f32

    tile = val.shape[0]
    d = val.shape[1]
    n_seg = acc_ref.shape[0]

    # In-kernel scatter mask (exact 0/1, bf16 for the MXU); padded rows (-1)
    # never match any column so they contribute nothing.
    cols = lax.broadcasted_iota(jnp.int32, (tile, n_seg), 1)
    seg_mask = jnp.where(idx == cols, 1.0, 0.0).astype(jnp.bfloat16)   # (TILE, NSEG)

    # Attention logits; softmax is shift-invariant so no segment-max pass.
    logit = jnp.sum(val * key, axis=1, keepdims=True) * scale          # (TILE, 1)
    exp_w = jnp.exp(logit)                                             # (TILE, 1)

    # Fused payload: numerator columns [0:D], denominator columns [D:2D]
    # (denominator replicated across lanes so the later divide is lane-aligned
    #  and the MXU output slab is fully used / lane-dense).
    payload = jnp.concatenate(
        [exp_w * val, jnp.broadcast_to(exp_w, (tile, d))], axis=1
    ).astype(jnp.bfloat16)                                             # (TILE, 2D)

    # (NSEG, TILE) @ (TILE, 2D) without materializing a transpose.
    acc_ref[...] += lax.dot_general(
        seg_mask, payload, (((0,), (0,)), ((), ())),
        preferred_element_type=jnp.float32)                            # (NSEG, 2D)

    @pl.when(t == pl.num_programs(0) - 1)
    def _finalize():
        acc = acc_ref[...]
        num = acc[:, :d]                                 # scatter_add(exp*val)
        den = jnp.maximum(acc[:, d:], 1e-30)             # empty segments -> 0/eps = 0
        agg = num / den                                  # softmax-weighted scatter add
        # F.normalize(p=2, dim=1, eps=1e-12) fused with residual add.
        norm = jnp.maximum(
            jnp.sqrt(jnp.sum(agg * agg, axis=1, keepdims=True)), 1e-12)
        emb = agg / norm
        out_ref[...] = jnp.concatenate([emb, res_ref[...] + emb], axis=1)


# ---------------------------------------------------------------------------
# Pallas wrapper
# ---------------------------------------------------------------------------

def _round_up(x, m):
    return ((x + m - 1) // m) * m


def hop_aggregate(idx, val, key, res, num_segments, *, scale, edge_tile):
    """Returns (normalized_emb, new_res) for one table of one hop."""
    E, D = val.shape
    edge_tile = max(8, _round_up(int(edge_tile), 8))
    Ep = _round_up(E, edge_tile)
    pad = Ep - E

    idx_p = jnp.pad(idx.astype(jnp.int32), (0, pad),
                    constant_values=-1).reshape(Ep, 1)
    val_p = jnp.pad(val, ((0, pad), (0, 0)))
    key_p = jnp.pad(key, ((0, pad), (0, 0)))

    out = pl.pallas_call(
        functools.partial(_hop_kernel, float(scale)),
        out_shape=jax.ShapeDtypeStruct((num_segments, 2 * D), jnp.float32),
        grid_spec=pltpu.PrefetchScalarGridSpec(
            num_scalar_prefetch=0,
            grid=(Ep // edge_tile,),
            in_specs=[
                pl.BlockSpec((edge_tile, 1), lambda t: (t, 0)),
                pl.BlockSpec((edge_tile, D), lambda t: (t, 0)),
                pl.BlockSpec((edge_tile, D), lambda t: (t, 0)),
                pl.BlockSpec((num_segments, D), lambda t: (0, 0)),
            ],
            out_specs=pl.BlockSpec((num_segments, 2 * D), lambda t: (0, 0)),
            scratch_shapes=[pltpu.VMEM((num_segments, 2 * D), jnp.float32)],
        ),
        compiler_params=pltpu.CompilerParams(
            dimension_semantics=("arbitrary",)),
    )(idx_p, val_p, key_p, res)

    return out[:, :D], out[:, D:]


# ---------------------------------------------------------------------------
# KGConv forward (glue in plain JAX: gathers + hop loop)
# ---------------------------------------------------------------------------

@functools.partial(jax.jit, static_argnames=("n_hops", "edge_tile"))
def kgconv_forward(user_emb, entity_emb, interact_emb, relation_emb,
                   edge_index, edge_type,
                   user_index, item_index, interact_type,
                   n_hops=2, edge_tile=512):
    head = edge_index[0]
    tail = edge_index[1]
    n_entities = entity_emb.shape[0]
    n_users = user_emb.shape[0]

    entity_res = entity_emb
    user_res = user_emb

    for _ in range(n_hops):
        # Row gathers stay in XLA (glue); the elementwise interaction*user
        # product fuses into the gather output so only one key stream is read.
        # TODO(synk): move gathers in-kernel (scalar-prefetched indices + DMA
        # row gather) to drop the gathered-copy HBM round trip on huge graphs.
        ent_tail = entity_emb[tail]                               # (E, D)
        rel_key = relation_emb[edge_type - 1]                     # (E, D)
        ent_item = entity_emb[item_index]                         # (I, D)
        user_key = interact_emb[interact_type] * user_emb[user_index]  # (I, D)

        entity_emb, entity_res = hop_aggregate(
            head, ent_tail, rel_key, entity_res, n_entities,
            scale=0.125, edge_tile=edge_tile)
        user_emb, user_res = hop_aggregate(
            user_index, ent_item, user_key, user_res, n_users,
            scale=1.0, edge_tile=edge_tile)

        # mess_dropout: eval-mode identity (deterministic kernel).
        # TODO(synk): training-mode nn.Dropout(p=0.2) not reproduced (stochastic).

    temp = jnp.zeros((), jnp.float32)  # att_w at hop i==3 never reached for n_hops<4
    return entity_res, user_res, temp


# ---------------------------------------------------------------------------
# Pure-JAX reference (for correctness check)
# ---------------------------------------------------------------------------

def _scatter_softmax_ref(vals, idx, n):
    seg_max = jax.ops.segment_max(vals, idx, num_segments=n)
    ex = jnp.exp(vals - seg_max[idx])
    seg_sum = jax.ops.segment_sum(ex, idx, num_segments=n)
    return ex / seg_sum[idx]


def kgconv_ref(user_emb, entity_emb, interact_emb, relation_emb,
               edge_index, edge_type, user_index, item_index, interact_type,
               n_hops=2):
    head, tail = edge_index[0], edge_index[1]
    n_entities = entity_emb.shape[0]
    n_users = user_emb.shape[0]
    entity_res, user_res = entity_emb, user_emb
    for _ in range(n_hops):
        neigh = entity_emb[tail]
        w1 = jnp.sum(neigh * relation_emb[edge_type - 1], axis=1) / 8.0
        w1 = _scatter_softmax_ref(w1, head, n_entities)[:, None]
        entity_agg = jax.ops.segment_sum(neigh * w1, head, num_segments=n_entities)

        ent_item = entity_emb[item_index]
        att = jnp.sum(interact_emb[interact_type] * user_emb[user_index] * ent_item,
                      axis=1)
        att = _scatter_softmax_ref(att, user_index, n_users)[:, None]
        user_agg = jax.ops.segment_sum(att * ent_item, user_index, num_segments=n_users)

        def _norm(x):
            n = jnp.maximum(jnp.linalg.norm(x, axis=1, keepdims=True), 1e-12)
            return x / n

        entity_emb = _norm(entity_agg)
        user_emb = _norm(user_agg)
        entity_res = entity_res + entity_emb
        user_res = user_res + user_emb
    return entity_res, user_res


# ---------------------------------------------------------------------------
# main
# ---------------------------------------------------------------------------

if __name__ == "__main__":
    key = jax.random.PRNGKey(0)
    ks = jax.random.split(key, 10)

    n_users, n_entities, n_relations, n_itypes = 8, 16, 4, 3
    D, E, I, n_hops = 64, 32, 24, 2

    user_emb = jax.random.normal(ks[0], (n_users, D), jnp.float32) * 0.1
    entity_emb = jax.random.normal(ks[1], (n_entities, D), jnp.float32) * 0.1
    interact_emb = jax.random.normal(ks[2], (n_itypes, D), jnp.float32) * 0.1
    relation_emb = jax.random.normal(ks[3], (n_relations, D), jnp.float32) * 0.1

    head = jax.random.randint(ks[4], (E,), 0, n_entities, jnp.int32)
    tail = jax.random.randint(ks[5], (E,), 0, n_entities, jnp.int32)
    edge_index = jnp.stack([head, tail], axis=0)                       # (2, E)
    edge_type = jax.random.randint(ks[6], (E,), 1, n_relations + 1, jnp.int32)

    # sparse interact_mat: indices = (user_index, item_index), values = interact_type
    user_index = jax.random.randint(ks[7], (I,), 0, n_users, jnp.int32)
    item_index = jax.random.randint(ks[8], (I,), 0, n_entities, jnp.int32)
    interact_type = jax.random.randint(ks[9], (I,), 0, n_itypes, jnp.int32)

    # NOTE: Aggregator's nn.Linear(64,1)/nn.Linear(64,64) are only used on the
    # 'GNN' path; agg='attention' (implemented here) has no learned parameters.

    # edge_tile=16 so the tiny demo exercises multi-step accumulation (grid > 1).
    ent_res, usr_res, temp = kgconv_forward(
        user_emb, entity_emb, interact_emb, relation_emb,
        edge_index, edge_type, user_index, item_index, interact_type,
        n_hops=n_hops, edge_tile=16)
    jax.block_until_ready((ent_res, usr_res, temp))

    ent_ref, usr_ref = kgconv_ref(
        user_emb, entity_emb, interact_emb, relation_emb,
        edge_index, edge_type, user_index, item_index, interact_type,
        n_hops=n_hops)

    # bf16 MXU inputs (f32 accumulation) -> relative error ~2^-9; tolerance set
    # accordingly while still catching any indexing/semantic bug.
    assert jnp.allclose(ent_res, ent_ref, atol=5e-3, rtol=5e-3), "entity mismatch"
    assert jnp.allclose(usr_res, usr_ref, atol=5e-3, rtol=5e-3), "user mismatch"

    print("KERNEL_OK")
</pallas_src>

<mosaic_0001>
module attributes {stable_mosaic.version = 11 : i64} {
  func.func @_hop_kernel(%arg0: i32, %arg1: memref<16x1xi32, #tpu.memory_space<vmem>>, %arg2: memref<16x64xf32, #tpu.memory_space<vmem>>, %arg3: memref<16x64xf32, #tpu.memory_space<vmem>>, %arg4: memref<16x64xf32, #tpu.memory_space<vmem>>, %arg5: memref<16x128xf32, #tpu.memory_space<vmem>>, %arg6: memref<16x128xf32, #tpu.memory_space<vmem>>) attributes {dimension_semantics = [#tpu.dimension_semantics<arbitrary>], iteration_bounds = array<i64: 2>, scalar_prefetch = 0 : i64, scratch_operands = 1 : i64, tpu.core_type = #tpu.core_type<tc>, window_params = [{transform_indices = @transform_0, window_bounds = array<i64: 16, 1>}, {transform_indices = @transform_1, window_bounds = array<i64: 16, 64>}, {transform_indices = @transform_2, window_bounds = array<i64: 16, 64>}, {pipeline_mode = #tpu.pipeline_mode<synchronous>, transform_indices = @transform_3, window_bounds = array<i64: 16, 64>}, {pipeline_mode = #tpu.pipeline_mode<synchronous>, transform_indices = @transform_4, window_bounds = array<i64: 16, 128>}]} {
    %c0_i32 = arith.constant 0 : i32
    %0 = arith.cmpi eq, %arg0, %c0_i32 : i32
    %1 = arith.extui %0 : i1 to i32
    %c0_i32_0 = arith.constant 0 : i32
    %2 = arith.cmpi ne, %1, %c0_i32_0 : i32
    scf.if %2 {
      %cst_15 = arith.constant 0.000000e+00 : f32
      %32 = vector.broadcast %cst_15 : f32 to vector<16x128xf32>
      %c0_16 = arith.constant 0 : index
      %c0_17 = arith.constant 0 : index
      %33 = vector.load %arg6[%c0_16, %c0_17] : memref<16x128xf32, #tpu.memory_space<vmem>>, vector<16x128xf32>
      tpu.vector_store %arg6[%c0_16, %c0_17], %32 {strides = array<i32>} : memref<16x128xf32, #tpu.memory_space<vmem>>, vector<16x128xf32>,
    } else {
    }
    %c0 = arith.constant 0 : index
    %c0_1 = arith.constant 0 : index
    %3 = vector.load %arg1[%c0, %c0_1] : memref<16x1xi32, #tpu.memory_space<vmem>>, vector<16x1xi32>
    %c0_2 = arith.constant 0 : index
    %c0_3 = arith.constant 0 : index
    %4 = vector.load %arg2[%c0_2, %c0_3] : memref<16x64xf32, #tpu.memory_space<vmem>>, vector<16x64xf32>
    %c0_4 = arith.constant 0 : index
    %c0_5 = arith.constant 0 : index
    %5 = vector.load %arg3[%c0_4, %c0_5] : memref<16x64xf32, #tpu.memory_space<vmem>>, vector<16x64xf32>
    %6 = tpu.iota {dimensions = array<i32: 1>} : vector<16x16xi32>
    %7 = vector.broadcast %3 : vector<16x1xi32> to vector<16x16xi32>
    %8 = arith.cmpi eq, %7, %6 : vector<16x16xi32>
    %cst = arith.constant 1.000000e+00 : f32
    %cst_6 = arith.constant 0.000000e+00 : f32
    %9 = vector.broadcast %cst : f32 to vector<16x16xf32>
    %10 = vector.broadcast %cst_6 : f32 to vector<16x16xf32>
    %11 = arith.select %8, %9, %10 : vector<16x16xi1>, vector<16x16xf32>
    %12 = arith.truncf %11 : vector<16x16xf32> to vector<16x16xbf16>
    %13 = arith.mulf %4, %5 : vector<16x64xf32>
    %cst_7 = arith.constant dense<0.000000e+00> : vector<16xf32>
    %14 = vector.multi_reduction <add>, %13, %cst_7 [1] : vector<16x64xf32> to vector<16xf32>
    %15 = vector.shape_cast %14 : vector<16xf32> to vector<16x1xf32>
    %cst_8 = arith.constant 1.250000e-01 : f32
    %16 = vector.broadcast %cst_8 : f32 to vector<16x1xf32>
    %17 = arith.mulf %15, %16 : vector<16x1xf32>
    %18 = math.exp %17 : vector<16x1xf32>
    %19 = vector.broadcast %18 : vector<16x1xf32> to vector<16x64xf32>
    %20 = arith.mulf %19, %4 : vector<16x64xf32>
    %21 = vector.shape_cast %18 : vector<16x1xf32> to vector<16x1xf32>
    %22 = vector.broadcast %21 : vector<16x1xf32> to vector<16x64xf32>
    %23 = tpu.concatenate %20, %22 in 1 : vector<16x64xf32>, vector<16x64xf32> -> vector<16x128xf32>
    %24 = arith.truncf %23 : vector<16x128xf32> to vector<16x128xbf16>
    %c0_9 = arith.constant 0 : index
    %c0_10 = arith.constant 0 : index
    %25 = vector.load %arg6[%c0_9, %c0_10] : memref<16x128xf32, #tpu.memory_space<vmem>>, vector<16x128xf32>
    %cst_11 = arith.constant dense<0.000000e+00> : vector<16x128xf32>
    %26 = tpu.matmul %12, %24, %cst_11 {dimension_numbers = #tpu.dot_dimension_numbers<[0], [0], [1], [1], [0, 1, 1, 1], [], []>} : vector<16x16xbf16>, vector<16x128xbf16>, vector<16x128xf32> -> vector<16x128xf32>
    %27 = arith.addf %25, %26 : vector<16x128xf32>
    %c0_12 = arith.constant 0 : index
    %c0_13 = arith.constant 0 : index
    %28 = vector.load %arg6[%c0_12, %c0_13] : memref<16x128xf32, #tpu.memory_space<vmem>>, vector<16x128xf32>
    tpu.vector_store %arg6[%c0_12, %c0_13], %27 {strides = array<i32>} : memref<16x128xf32, #tpu.memory_space<vmem>>, vector<16x128xf32>,
    %c1_i32 = arith.constant 1 : i32
    %29 = arith.cmpi eq, %arg0, %c1_i32 : i32
    %30 = arith.extui %29 : i1 to i32
    %c0_i32_14 = arith.constant 0 : i32
    %31 = arith.cmpi ne, %30, %c0_i32_14 : i32
    scf.if %31 {
      %c0_15 = arith.constant 0 : index
      %c0_16 = arith.constant 0 : index
      %32 = vector.load %arg6[%c0_15, %c0_16] : memref<16x128xf32, #tpu.memory_space<vmem>>, vector<16x128xf32>
      %33 = vector.extract_strided_slice %32 {offsets = [0, 0], sizes = [16, 64], strides = [1, 1]} : vector<16x128xf32> to vector<16x64xf32>
      %34 = vector.extract_strided_slice %32 {offsets = [0, 64], sizes = [16, 64], strides = [1, 1]} : vector<16x128xf32> to vector<16x64xf32>
      %cst_17 = arith.constant 1.000000e-30 : f32
      %35 = vector.broadcast %cst_17 : f32 to vector<16x64xf32>
      %36 = arith.maximumf %34, %35 : vector<16x64xf32>
      %37 = arith.divf %33, %36 : vector<16x64xf32>
      %38 = arith.mulf %37, %37 : vector<16x64xf32>
      %cst_18 = arith.constant dense<0.000000e+00> : vector<16xf32>
      %39 = vector.multi_reduction <add>, %38, %cst_18 [1] : vector<16x64xf32> to vector<16xf32>
      %40 = vector.shape_cast %39 : vector<16xf32> to vector<16x1xf32>
      %41 = math.sqrt %40 : vector<16x1xf32>
      %cst_19 = arith.constant 9.99999996E-13 : f32
      %42 = vector.broadcast %cst_19 : f32 to vector<16x1xf32>
      %43 = arith.maximumf %41, %42 : vector<16x1xf32>
      %44 = vector.broadcast %43 : vector<16x1xf32> to vector<16x64xf32>
      %45 = arith.divf %37, %44 : vector<16x64xf32>
      %c0_20 = arith.constant 0 : index
      %c0_21 = arith.constant 0 : index
      %46 = vector.load %arg4[%c0_20, %c0_21] : memref<16x64xf32, #tpu.memory_space<vmem>>, vector<16x64xf32>
      %47 = arith.addf %46, %45 : vector<16x64xf32>
      %48 = tpu.concatenate %45, %47 in 1 : vector<16x64xf32>, vector<16x64xf32> -> vector<16x128xf32>
      %c0_22 = arith.constant 0 : index
      %c0_23 = arith.constant 0 : index
      %49 = vector.load %arg5[%c0_22, %c0_23] : memref<16x128xf32, #tpu.memory_space<vmem>>, vector<16x128xf32>
      tpu.vector_store %arg5[%c0_22, %c0_23], %48 {strides = array<i32>} : memref<16x128xf32, #tpu.memory_space<vmem>>, vector<16x128xf32>,
    } else {
    }
    return
  }
  func.func @transform_0(%arg0: i32) -> (i32, i32) {
    %c0_i32 = arith.constant 0 : i32
    %c0_i32_0 = arith.constant 0 : i32
    return %arg0, %c0_i32 : i32, i32
  }
  func.func @transform_1(%arg0: i32) -> (i32, i32) {
    %c0_i32 = arith.constant 0 : i32
    %c0_i32_0 = arith.constant 0 : i32
    return %arg0, %c0_i32 : i32, i32
  }
  func.func @transform_2(%arg0: i32) -> (i32, i32) {
    %c0_i32 = arith.constant 0 : i32
    %c0_i32_0 = arith.constant 0 : i32
    return %arg0, %c0_i32 : i32, i32
  }
  func.func @transform_3(%arg0: i32) -> (i32, i32) {
    %c0_i32 = arith.constant 0 : i32
    %c0_i32_0 = arith.constant 0 : i32
    %c0_i32_1 = arith.constant 0 : i32
    return %c0_i32, %c0_i32_0 : i32, i32
  }
  func.func @transform_4(%arg0: i32) -> (i32, i32) {
    %c0_i32 = arith.constant 0 : i32
    %c0_i32_0 = arith.constant 0 : i32
    %c0_i32_1 = arith.constant 0 : i32
    return %c0_i32, %c0_i32_0 : i32, i32
  }
}

module attributes {stable_mosaic.version = 11 : i64} {
  func.func @_hop_kernel(%arg0: i32, %arg1: memref<16x1xi32, #tpu.memory_space<vmem>>, %arg2: memref<16x64xf32, #tpu.memory_space<vmem>>, %arg3: memref<16x64xf32, #tpu.memory_space<vmem>>, %arg4: memref<8x64xf32, #tpu.memory_space<vmem>>, %arg5: memref<8x128xf32, #tpu.memory_space<vmem>>, %arg6: memref<8x128xf32, #tpu.memory_space<vmem>>) attributes {dimension_semantics = [#tpu.dimension_semantics<arbitrary>], iteration_bounds = array<i64: 2>, scalar_prefetch = 0 : i64, scratch_operands = 1 : i64, tpu.core_type = #tpu.core_type<tc>, window_params = [{transform_indices = @transform_0, window_bounds = array<i64: 16, 1>}, {transform_indices = @transform_1, window_bounds = array<i64: 16, 64>}, {transform_indices = @transform_2, window_bounds = array<i64: 16, 64>}, {pipeline_mode = #tpu.pipeline_mode<synchronous>, transform_indices = @transform_3, window_bounds = array<i64: 8, 64>}, {pipeline_mode = #tpu.pipeline_mode<synchronous>, transform_indices = @transform_4, window_bounds = array<i64: 8, 128>}]} {
    %c0_i32 = arith.constant 0 : i32
    %0 = arith.cmpi eq, %arg0, %c0_i32 : i32
    %1 = arith.extui %0 : i1 to i32
    %c0_i32_0 = arith.constant 0 : i32
    %2 = arith.cmpi ne, %1, %c0_i32_0 : i32
    scf.if %2 {
      %cst_15 = arith.constant 0.000000e+00 : f32
      %32 = vector.broadcast %cst_15 : f32 to vector<8x128xf32>
      %c0_16 = arith.constant 0 : index
      %c0_17 = arith.constant 0 : index
      %33 = vector.load %arg6[%c0_16, %c0_17] : memref<8x128xf32, #tpu.memory_space<vmem>>, vector<8x128xf32>
      tpu.vector_store %arg6[%c0_16, %c0_17], %32 {strides = array<i32>} : memref<8x128xf32, #tpu.memory_space<vmem>>, vector<8x128xf32>,
    } else {
    }
    %c0 = arith.constant 0 : index
    %c0_1 = arith.constant 0 : index
    %3 = vector.load %arg1[%c0, %c0_1] : memref<16x1xi32, #tpu.memory_space<vmem>>, vector<16x1xi32>
    %c0_2 = arith.constant 0 : index
    %c0_3 = arith.constant 0 : index
    %4 = vector.load %arg2[%c0_2, %c0_3] : memref<16x64xf32, #tpu.memory_space<vmem>>, vector<16x64xf32>
    %c0_4 = arith.constant 0 : index
    %c0_5 = arith.constant 0 : index
    %5 = vector.load %arg3[%c0_4, %c0_5] : memref<16x64xf32, #tpu.memory_space<vmem>>, vector<16x64xf32>
    %6 = tpu.iota {dimensions = array<i32: 1>} : vector<16x8xi32>
    %7 = vector.broadcast %3 : vector<16x1xi32> to vector<16x8xi32>
    %8 = arith.cmpi eq, %7, %6 : vector<16x8xi32>
    %cst = arith.constant 1.000000e+00 : f32
    %cst_6 = arith.constant 0.000000e+00 : f32
    %9 = vector.broadcast %cst : f32 to vector<16x8xf32>
    %10 = vector.broadcast %cst_6 : f32 to vector<16x8xf32>
    %11 = arith.select %8, %9, %10 : vector<16x8xi1>, vector<16x8xf32>
    %12 = arith.truncf %11 : vector<16x8xf32> to vector<16x8xbf16>
    %13 = arith.mulf %4, %5 : vector<16x64xf32>
    %cst_7 = arith.constant dense<0.000000e+00> : vector<16xf32>
    %14 = vector.multi_reduction <add>, %13, %cst_7 [1] : vector<16x64xf32> to vector<16xf32>
    %15 = vector.shape_cast %14 : vector<16xf32> to vector<16x1xf32>
    %cst_8 = arith.constant 1.000000e+00 : f32
    %16 = vector.broadcast %cst_8 : f32 to vector<16x1xf32>
    %17 = arith.mulf %15, %16 : vector<16x1xf32>
    %18 = math.exp %17 : vector<16x1xf32>
    %19 = vector.broadcast %18 : vector<16x1xf32> to vector<16x64xf32>
    %20 = arith.mulf %19, %4 : vector<16x64xf32>
    %21 = vector.shape_cast %18 : vector<16x1xf32> to vector<16x1xf32>
    %22 = vector.broadcast %21 : vector<16x1xf32> to vector<16x64xf32>
    %23 = tpu.concatenate %20, %22 in 1 : vector<16x64xf32>, vector<16x64xf32> -> vector<16x128xf32>
    %24 = arith.truncf %23 : vector<16x128xf32> to vector<16x128xbf16>
    %c0_9 = arith.constant 0 : index
    %c0_10 = arith.constant 0 : index
    %25 = vector.load %arg6[%c0_9, %c0_10] : memref<8x128xf32, #tpu.memory_space<vmem>>, vector<8x128xf32>
    %cst_11 = arith.constant dense<0.000000e+00> : vector<8x128xf32>
    %26 = tpu.matmul %12, %24, %cst_11 {dimension_numbers = #tpu.dot_dimension_numbers<[0], [0], [1], [1], [0, 1, 1, 1], [], []>} : vector<16x8xbf16>, vector<16x128xbf16>, vector<8x128xf32> -> vector<8x128xf32>
    %27 = arith.addf %25, %26 : vector<8x128xf32>
    %c0_12 = arith.constant 0 : index
    %c0_13 = arith.constant 0 : index
    %28 = vector.load %arg6[%c0_12, %c0_13] : memref<8x128xf32, #tpu.memory_space<vmem>>, vector<8x128xf32>
    tpu.vector_store %arg6[%c0_12, %c0_13], %27 {strides = array<i32>} : memref<8x128xf32, #tpu.memory_space<vmem>>, vector<8x128xf32>,
    %c1_i32 = arith.constant 1 : i32
    %29 = arith.cmpi eq, %arg0, %c1_i32 : i32
    %30 = arith.extui %29 : i1 to i32
    %c0_i32_14 = arith.constant 0 : i32
    %31 = arith.cmpi ne, %30, %c0_i32_14 : i32
    scf.if %31 {
      %c0_15 = arith.constant 0 : index
      %c0_16 = arith.constant 0 : index
      %32 = vector.load %arg6[%c0_15, %c0_16] : memref<8x128xf32, #tpu.memory_space<vmem>>, vector<8x128xf32>
      %33 = vector.extract_strided_slice %32 {offsets = [0, 0], sizes = [8, 64], strides = [1, 1]} : vector<8x128xf32> to vector<8x64xf32>
      %34 = vector.extract_strided_slice %32 {offsets = [0, 64], sizes = [8, 64], strides = [1, 1]} : vector<8x128xf32> to vector<8x64xf32>
      %cst_17 = arith.constant 1.000000e-30 : f32
      %35 = vector.broadcast %cst_17 : f32 to vector<8x64xf32>
      %36 = arith.maximumf %34, %35 : vector<8x64xf32>
      %37 = arith.divf %33, %36 : vector<8x64xf32>
      %38 = arith.mulf %37, %37 : vector<8x64xf32>
      %cst_18 = arith.constant dense<0.000000e+00> : vector<8xf32>
      %39 = vector.multi_reduction <add>, %38, %cst_18 [1] : vector<8x64xf32> to vector<8xf32>
      %40 = vector.shape_cast %39 : vector<8xf32> to vector<8x1xf32>
      %41 = math.sqrt %40 : vector<8x1xf32>
      %cst_19 = arith.constant 9.99999996E-13 : f32
      %42 = vector.broadcast %cst_19 : f32 to vector<8x1xf32>
      %43 = arith.maximumf %41, %42 : vector<8x1xf32>
      %44 = vector.broadcast %43 : vector<8x1xf32> to vector<8x64xf32>
      %45 = arith.divf %37, %44 : vector<8x64xf32>
      %c0_20 = arith.constant 0 : index
      %c0_21 = arith.constant 0 : index
      %46 = vector.load %arg4[%c0_20, %c0_21] : memref<8x64xf32, #tpu.memory_space<vmem>>, vector<8x64xf32>
      %47 = arith.addf %46, %45 : vector<8x64xf32>
      %48 = tpu.concatenate %45, %47 in 1 : vector<8x64xf32>, vector<8x64xf32> -> vector<8x128xf32>
      %c0_22 = arith.constant 0 : index
      %c0_23 = arith.constant 0 : index
      %49 = vector.load %arg5[%c0_22, %c0_23] : memref<8x128xf32, #tpu.memory_space<vmem>>, vector<8x128xf32>
      tpu.vector_store %arg5[%c0_22, %c0_23], %48 {strides = array<i32>} : memref<8x128xf32, #tpu.memory_space<vmem>>, vector<8x128xf32>,
    } else {
    }
    return
  }
  func.func @transform_0(%arg0: i32) -> (i32, i32) {
    %c0_i32 = arith.constant 0 : i32
    %c0_i32_0 = arith.constant 0 : i32
    return %arg0, %c0_i32 : i32, i32
  }
  func.func @transform_1(%arg0: i32) -> (i32, i32) {
    %c0_i32 = arith.constant 0 : i32
    %c0_i32_0 = arith.constant 0 : i32
    return %arg0, %c0_i32 : i32, i32
  }
  func.func @transform_2(%arg0: i32) -> (i32, i32) {
    %c0_i32 = arith.constant 0 : i32
    %c0_i32_0 = arith.constant 0 : i32
    return %arg0, %c0_i32 : i32, i32
  }
  func.func @transform_3(%arg0: i32) -> (i32, i32) {
    %c0_i32 = arith.constant 0 : i32
    %c0_i32_0 = arith.constant 0 : i32
    %c0_i32_1 = arith.constant 0 : i32
    return %c0_i32, %c0_i32_0 : i32, i32
  }
  func.func @transform_4(%arg0: i32) -> (i32, i32) {
    %c0_i32 = arith.constant 0 : i32
    %c0_i32_0 = arith.constant 0 : i32
    %c0_i32_1 = arith.constant 0 : i32
    return %c0_i32, %c0_i32_0 : i32, i32
  }
}

</mosaic_0001>

<bundles_post_ra>
// kernel: mul.2
= control target key start
LH: loop header
LB: loop body
LE: loop exit
PB: predicated region body
PF: predicated region fallthrough
CT: control target
= control target key end

     0   :  { %s78_s0 = inlined_call_operand.vmem [shape: f32[24,64], index: 0, kind: input, shape index: {}]   ;;  %s79_s1 = inlined_call_operand.vmem [shape: f32[24,64], index: 1, kind: input, shape index: {}]   ;;  %s80_s2 = inlined_call_operand.vmem [shape: f32[24,64], index: 2, kind: output, shape index: {}]  }
   0x1   :  { %v3_v0 = vld [vmem:[%s78_s0] sm:$0xff]  ;;  %v30_v2 = vld [vmem:[%s78_s0 + $0x8] sm:$0xff]  ;;  %v33_v5 = vld [vmem:[%s78_s0 + $0x10] sm:$0xff] }
   0x2   :  { %v4_v1 = vld [vmem:[%s79_s1] sm:$0xff]  ;;  %v31_v4 = vld [vmem:[%s79_s1 + $0x8] sm:$0xff]  ;;  %v34_v6 = vld [vmem:[%s79_s1 + $0x10] sm:$0xff] }
   0x3   :  { %v7_v3 = vmul.f32 %v4_v1, %v3_v0  ;;  %v16_v7 = vmul.f32 %v31_v4, %v30_v2  ;;  %v26_v8 = vmul.f32 %v34_v6, %v33_v5 }
   0x5   :  { %9 = vst [vmem:[%s80_s2] sm:$0xff] %v7_v3 }
   0x6   :  { %32 = vst [vmem:[%s80_s2 + $0x8] sm:$0xff] %v16_v7 }
   0x7   :  { %35 = vst [vmem:[%s80_s2 + $0x10] sm:$0xff] %v26_v8 }

// kernel: kgconv_forward.4
= control target key start
LH: loop header
LB: loop body
LE: loop exit
PB: predicated region body
PF: predicated region fallthrough
CT: control target
= control target key end

     0   :  { %s574_s15 = smov 0   ;;  %s633_s0 = inlined_call_operand.vmem [shape: s32[32,1], index: 0, kind: input, shape index: {}]   ;;  %s634_s1 = inlined_call_operand.vmem [shape: f32[32,64], index: 1, kind: input, shape index: {}]   ;;  %s635_s2 = inlined_call_operand.vmem [shape: f32[32,64], index: 2, kind: input, shape index: {}]   ;;  %s636_s3 = inlined_call_operand.vmem [shape: f32[16,64], index: 3, kind: input, shape index: {}]   ;;  %s637_s4 = inlined_call_operand.vmem [shape: f32[16,128], index: 4, kind: output, shape index: {}]  }
   0x1 LB: > { %s580_s16 = sadd.s32 4294967295, %s543_s15   ;;  %p496_p0 = scmp.ge.s32.totalorder %s543_s15, 1  ;;  %s543_s15 = sphi %s574_s15, %s14_s15  }
   0x2   : > { %p180_p1 = scmp.lt.s32.totalorder %s543_s15, 3 }
   0x4   : > { %p181_p2 = pnand %p496_p0, %p180_p1 }
   0x5   : > { %s497_s17 = sshll.u32 (!%p181_p2), %s580_s16, 1  ;;  %p503_p4 = scmp.ne.s32.totalorder (!%p181_p2), %s580_s16, 0 }
   0x6   : > { %184 = sbr.rel (%p181_p2) target bundleno = 848 (0x350), region = 36  ;;  %p212_p3 = scmp.lt.s32.totalorder (!%p181_p2), %s497_s17, 3 }
   0xb   : > { %s639_s17 = smov (!%p212_p3, %s497_s17), 3  ;;  %233 = sbr.rel (%p503_p4) target bundleno = 19 (0x13), region = 40 }
   0xc   : > { %s498_s18 = sshll.u32 %s639_s17, 3 }
   0xd   : > { %s215_s21 = scalar_lea.vmem %s633_s0, %s498_s18  ;;  %s221_s24 = scalar_lea.vmem %s634_s1, %s498_s18 }
   0xe   : > { %s227_s27 = scalar_lea.vmem %s635_s2, %s498_s18 }
  0x10   : > { %v545_v0 = vmov 0.0  }
  0x11   : > { %234 = vst [vmem:[#allocation2] sm:$0xff] %v545_v0 }
  0x12   : > { %235 = vst [vmem:[#allocation2 + $0x8] sm:$0xff] %v545_v0 }
  0x13 PF: > { %v236_v1 = vld [vmem:[%s215_s21] sm:$0xff]  ;;  %v546_v2 = vmov 0   ;;  %v237_v3 = vld [vmem:[%s215_s21 + $0x8] sm:$0xff]  ;;  %vm257_vm0 = vcmask 523264   ;;  %v242_v12 = vlaneseq  ;;  %v547_v16 = vmov 0.0   ;;  %p505_p5 = scmp.ne.s32.totalorder %s580_s16, 1 }
  0x14   : > { %520 = vset.pattern.permute.xlu0 %v546_v2  ;;  %v238_v4 = vld [vmem:[%s221_s24] sm:$0xff]  ;;  %v239_v7 = vld [vmem:[%s221_s24 + $0x8] sm:$0xff]  ;;  %vm293_vm3 = vcmask 130048   ;;  %s548_s28 = smov (!%p505_p5), 64  }
  0x15   : > { %245 = vperm.xlu0 %520, %v236_v1   ;;  %v240_v5 = vld [vmem:[%s227_s27] sm:$0xff]  ;;  %v241_v8 = vld [vmem:[%s227_s27 + $0x8] sm:$0xff]  ;;  %v243_v14 = vand.u32 127, %v242_v12 }
  0x16   : > { %v255_v6 = vmul.f32 %v240_v5, %v238_v4  ;;  %v256_v10 = vmul.f32 %v241_v8, %v239_v7 }
  0x18   : > { %v258_v9 = vsel %vm257_vm0, %v255_v6, 0.0  ;;  %v261_v11 = vsel %vm257_vm0, %v256_v10, 0.0  ;;  %v275_v34 = vld [vmem:[#allocation2] sm:$0xff] }
  0x19   : > { %259 = vadd.xlane.f32.xlu1 %v258_v9  ;;  %v276_v37 = vld [vmem:[#allocation2 + $0x8] sm:$0xff] }
  0x1d   : > { %248 = vperm.xlu0 %520, %v237_v3  }
  0x21   : > { %262 = vadd.xlane.f32.xlu1 %v261_v11 }
  0x87   : > { %v246_v13 = vpop.permute.xlu0 %245 }
  0x88   : > { %vm250_vm1 = vcmp.eq.s32.totalorder %v246_v13, %v243_v14 }
  0x89   : > { %v252_v17 = vsel %vm250_vm1, 1.0, %v547_v16 }
  0x8c   : > { %v260_v20 = vpop.xlane.xlu1 %259 }
  0x8d   : > { %v264_v21 = vmul.f32 0.125, %v260_v20 }
  0x8f   : > { %v249_v15 = vpop.permute.xlu0 %248  ;;  %v266_v22 = vmul.f32 1.442695, %v264_v21 }
  0x90   : > { %vm251_vm2 = vcmp.eq.s32.totalorder %v249_v15, %v243_v14 }
  0x91   : > { %v253_v18 = vsel %vm251_vm2, 1.0, %v547_v16  ;;  %521 = vpow2.f32 %v266_v22 }
  0x92   : > { %v254_v19 = vpack.c.bf16 %v253_v18, %v252_v17 }
  0x94   : > { %277 = vxpose.xlu2.c.b16.start.end [1/1] (short) (narrow) %v254_v19, 16  ;;  %v263_v23 = vpop.xlane.xlu1 %262 }
  0x95   : > { %v265_v24 = vmul.f32 0.125, %v263_v23 }
  0x97   : > { %v268_v25 = vmul.f32 1.442695, %v265_v24  ;;  %v522_v26 = vpop.eup %521 }
  0x98   : > { %v270_v27 = vmul.f32 %v522_v26, %v238_v4 }
  0x99   : > { %523 = vpow2.f32 %v268_v25 }
  0x9a   : > { %v272_v30 = vsel %vm257_vm0, %v270_v27, %v522_v26 }
  0x9f   : > { %v524_v28 = vpop.eup %523 }
  0xa0   : > { %v271_v29 = vmul.f32 %v524_v28, %v239_v7 }
  0xa2   : > { %v273_v31 = vsel %vm257_vm0, %v271_v29, %v524_v28 }
  0xa3   : > { %v274_v32 = vpack.c.bf16 %v273_v31, %v272_v30 }
  0xa5   : > { %304 = vmatpush.bf16.msra.mxu0 %v274_v32 }
 0x135   : > { %v285_v33 = vpop.trf.xlu2 }
 0x136   : > { %504 = vmatmul.msk.bf16.vlgmr.msra.gmra.mxu0 %vm293_vm3, %v285_v33 }
 0x1b3   : > { %v306_v35 = vpop.f32.mrf.mxu0 }
 0x1b4   : > { %v311_v36 = vadd.f32 %v306_v35, %v275_v34 }
 0x1b6   : > { %313 = vst [vmem:[#allocation2] sm:$0xff] %v311_v36 }
 0x1ba   : > { %318 = sbr.rel (%p505_p5) target bundleno = 848 (0x350), region = 44 }
 0x1bb   : > { %v308_v38 = vpop.f32.mrf.mxu0 }
 0x1bc   : > { %v312_v39 = vadd.f32 %v308_v38, %v276_v37 }
 0x1be   : > { %314 = vst [vmem:[#allocation2 + $0x8] sm:$0xff] %v312_v39 }
 0x1bf   : > { %v319_v40 = vld [vmem:[#allocation2] sm:$0xff] }
 0x1c0   : > { %v321_v41 = vmax.f32 %v319_v40, 1e-30 }
 0x1c2   : > { %325 = vrot.lane.b32.xlu0 %v321_v41, %s548_s28 }
 0x1c5   : > { %v320_v42 = vld [vmem:[#allocation2 + $0x8] sm:$0xff] }
 0x1c6   : > { %v322_v43 = vmax.f32 %v320_v42, 1e-30 }
 0x1ca   : > { %327 = vrot.lane.b32.xlu0 %v322_v43, %s548_s28 }
 0x234   : > { %v326_v44 = vpop.permute.xlu0 %325 }
 0x235   : > { %525 = vrcp.f32 %v326_v44  ;;  %v342_v49 = vand.u32 2147483648, %v326_v44  ;;  %v340_v51 = vand.u32 2147483647, %v326_v44  ;;  %vm336_vm5 = vweird.f32 %v326_v44 }
 0x237   : > { %v343_v54 = vor.u32 1.1754944e-38, %v342_v49  ;;  %vm341_vm7 = vcmp.eq.f32.partialorder %v340_v51, 8.507059e+37 }
 0x23b   : > { %v526_v45 = vpop.eup %525 }
 0x23c   : > { %v332_v46 = vmul.f32 %v526_v45, %v326_v44  ;;  %v328_v47 = vpop.permute.xlu0 %327  ;;  %vm337_vm4 = vweird.f32 %v526_v45  ;;  %v425_v44 = vld [vmem:[%s636_s3] sm:$0xff] }
 0x23d   : > { %527 = vrcp.f32 %v328_v47  ;;  %vm338_vm6 = vmor %vm336_vm5, %vm337_vm4  ;;  %v357_v60 = vand.u32 2147483648, %v328_v47  ;;  %v355_v62 = vand.u32 2147483647, %v328_v47  ;;  %vm351_vm9 = vweird.f32 %v328_v47 }
 0x23e   : > { %v333_v48 = vsub.f32 1.0, %v332_v46 }
 0x23f   : > { %v358_v2 = vor.u32 1.1754944e-38, %v357_v60  ;;  %vm356_vm11 = vcmp.eq.f32.partialorder %v355_v62, 8.507059e+37 }
 0x240   : > { %v334_v50 = vmul.f32 %v526_v45, %v333_v48 }
 0x242   : > { %v335_v52 = vadd.f32 %v526_v45, %v334_v50 }
 0x243   : > { %v528_v53 = vpop.eup %527 }
 0x244   : > { %v347_v55 = vmul.f32 %v528_v53, %v328_v47  ;;  %v339_v56 = vsel %vm338_vm6, %v526_v45, %v335_v52  ;;  %vm352_vm8 = vweird.f32 %v528_v53 }
 0x245   : > { %v344_v57 = vsel %vm341_vm7, %v343_v54, %v339_v56  ;;  %vm353_vm10 = vmor %vm351_vm9, %vm352_vm8 }
 0x246   : > { %v348_v58 = vsub.f32 1.0, %v347_v55  ;;  %v602_v59 = vmul.f32 %v344_v57, %v319_v40  ;;  %v426_v55 = vld [vmem:[%s636_s3 + $0x8] sm:$0xff] }
 0x248   : > { %v349_v61 = vmul.f32 %v528_v53, %v348_v58  ;;  %v361_v63 = vmul.f32 %v602_v59, %v602_v59 }
 0x24a   : > { %v350_v0 = vadd.f32 %v528_v53, %v349_v61  ;;  %v363_v1 = vsel %vm257_vm0, %v361_v63, 0.0 }
 0x24b   : > { %364 = vadd.xlane.f32.xlu1 %v363_v1 }
 0x24c   : > { %v354_v3 = vsel %vm353_vm10, %v528_v53, %v350_v0 }
 0x24d   : > { %v359_v4 = vsel %vm356_vm11, %v358_v2, %v354_v3 }
 0x24e   : > { %v607_v5 = vmul.f32 %v359_v4, %v320_v42 }
 0x250   : > { %v362_v6 = vmul.f32 %v607_v5, %v607_v5 }
 0x252   : > { %v366_v7 = vsel %vm257_vm0, %v362_v6, 0.0 }
 0x253   : > { %367 = vadd.xlane.f32.xlu1 %v366_v7 }
 0x2be   : > { %v365_v8 = vpop.xlane.xlu1 %364 }
 0x2bf   : > { %529 = vrsqrt.f32 %v365_v8  ;;  %vm376_vm12 = vcmp.eq.f32.partialorder %v365_v8, inf  ;;  %v379_v20 = vand.u32 2147483648, %v365_v8  ;;  %vm378_vm13 = vcmp.eq.f32.partialorder %v365_v8, 0.0 }
 0x2c5   : > { %v530_v9 = vpop.eup %529 }
 0x2c6   : > { %v370_v10 = vmul.f32 %v530_v9, %v365_v8  ;;  %v368_v11 = vpop.xlane.xlu1 %367 }
 0x2c7   : > { %531 = vrsqrt.f32 %v368_v11  ;;  %vm388_vm14 = vcmp.eq.f32.partialorder %v368_v11, inf  ;;  %v391_v28 = vand.u32 2147483648, %v368_v11  ;;  %vm390_vm15 = vcmp.eq.f32.partialorder %v368_v11, 0.0 }
 0x2c8   : > { %v371_v12 = vmul.f32 %v530_v9, %v370_v10 }
 0x2ca   : > { %v372_v13 = vmul.f32 0.5, %v371_v12 }
 0x2cc   : > { %v373_v14 = vsub.f32 1.5, %v372_v13 }
 0x2cd   : > { %v532_v15 = vpop.eup %531 }
 0x2ce   : > { %v374_v16 = vmul.f32 %v530_v9, %v373_v14  ;;  %v382_v17 = vmul.f32 %v532_v15, %v368_v11 }
 0x2d0   : > { %v375_v18 = vmul.f32 %v374_v16, %v365_v8  ;;  %v383_v19 = vmul.f32 %v532_v15, %v382_v17 }
 0x2d2   : > { %v377_v21 = vsel %vm376_vm12, %v365_v8, %v375_v18  ;;  %v384_v22 = vmul.f32 0.5, %v383_v19 }
 0x2d3   : > { %v380_v23 = vsel %vm378_vm13, %v379_v20, %v377_v21 }
 0x2d4   : > { %v393_v24 = vmax.f32 %v380_v23, 1e-12  ;;  %v385_v25 = vsub.f32 1.5, %v384_v22 }
 0x2d6   : > { %533 = vrcp.f32 %v393_v24  ;;  %v386_v26 = vmul.f32 %v532_v15, %v385_v25  ;;  %v406_v35 = vand.u32 2147483648, %v393_v24  ;;  %v404_v37 = vand.u32 2147483647, %v393_v24 }
 0x2d7   : > { %vm400_vm2 = vweird.f32 %v393_v24 }
 0x2d8   : > { %v387_v27 = vmul.f32 %v386_v26, %v368_v11  ;;  %v407_v40 = vor.u32 1.1754944e-38, %v406_v35  ;;  %vm405_vm4 = vcmp.eq.f32.partialorder %v404_v37, 8.507059e+37 }
 0x2da   : > { %v389_v29 = vsel %vm388_vm14, %v368_v11, %v387_v27 }
 0x2db   : > { %v392_v30 = vsel %vm390_vm15, %v391_v28, %v389_v29 }
 0x2dc   : > { %v534_v31 = vpop.eup %533  ;;  %v394_v32 = vmax.f32 %v392_v30, 1e-12 }
 0x2dd   : > { %v396_v33 = vmul.f32 %v534_v31, %v393_v24  ;;  %vm401_vm1 = vweird.f32 %v534_v31 }
 0x2de   : > { %535 = vrcp.f32 %v394_v32  ;;  %vm402_vm3 = vmor %vm400_vm2, %vm401_vm1  ;;  %v421_v47 = vand.u32 2147483648, %v394_v32  ;;  %v419_v50 = vand.u32 2147483647, %v394_v32  ;;  %vm415_vm6 = vweird.f32 %v394_v32 }
 0x2df   : > { %v397_v34 = vsub.f32 1.0, %v396_v33 }
 0x2e0   : > { %v422_v52 = vor.u32 1.1754944e-38, %v421_v47  ;;  %vm420_vm8 = vcmp.eq.f32.partialorder %v419_v50, 8.507059e+37 }
 0x2e1   : > { %v398_v36 = vmul.f32 %v534_v31, %v397_v34 }
 0x2e3   : > { %v399_v38 = vadd.f32 %v534_v31, %v398_v36 }
 0x2e4   : > { %v536_v39 = vpop.eup %535 }
 0x2e5   : > { %v403_v41 = vsel %vm402_vm3, %v534_v31, %v399_v38  ;;  %v411_v42 = vmul.f32 %v536_v39, %v394_v32  ;;  %vm416_vm5 = vweird.f32 %v536_v39 }
 0x2e6   : > { %v408_v43 = vsel %vm405_vm4, %v407_v40, %v403_v41  ;;  %vm417_vm7 = vmor %vm415_vm6, %vm416_vm5 }
 0x2e7   : > { %v409_v45 = vmul.f32 %v408_v43, %v602_v59  ;;  %v412_v46 = vsub.f32 1.0, %v411_v42 }
 0x2e9   : > { %v427_v48 = vadd.f32 %v425_v44, %v409_v45  ;;  %v413_v49 = vmul.f32 %v536_v39, %v412_v46 }
 0x2eb   : > { %431 = vrot.lane.b32.xlu2 %v427_v48, %s548_s28  ;;  %v414_v51 = vadd.f32 %v536_v39, %v413_v49 }
 0x2ed   : > { %v418_v53 = vsel %vm417_vm7, %v536_v39, %v414_v51 }
 0x2ee   : > { %v423_v54 = vsel %vm420_vm8, %v422_v52, %v418_v53 }
 0x2ef   : > { %v424_v56 = vmul.f32 %v423_v54, %v607_v5 }
 0x2f1   : > { %v428_v57 = vadd.f32 %v426_v55, %v424_v56 }
 0x2f3   : > { %433 = vrot.lane.b32.xlu2 %v428_v57, %s548_s28 }
 0x345   : > { %v432_v58 = vpop.permute.xlu2 %431 }
 0x346   : > { %v437_v59 = vsel %vm257_vm0, %v409_v45, %v432_v58 }
 0x347   : > { %439 = vst [vmem:[%s637_s4] sm:$0xff] %v437_v59 }
 0x34d   : > { %v434_v60 = vpop.permute.xlu2 %433 }
 0x34e   : > { %v438_v61 = vsel %vm257_vm0, %v424_v56, %v434_v60 }
 0x34f   : > { %440 = vst [vmem:[%s637_s4 + $0x8] sm:$0xff] %v438_v61 }
 0x350 PF: > { %s14_s15 = sadd.s32 1, %s543_s15  }
 0x351   : > { %p11_p6 = scmp.ge.s32.totalorder %s14_s15, 4  }
 0x353   :  { %13 = sbr.rel (!%p11_p6) target bundleno = 1 (0x1), region = 76 }

// kernel: kgconv_forward.5
= control target key start
LH: loop header
LB: loop body
LE: loop exit
PB: predicated region body
PF: predicated region fallthrough
CT: control target
= control target key end

     0   :  { %s500_s15 = smov 0   ;;  %s539_s0 = inlined_call_operand.vmem [shape: s32[32,1], index: 0, kind: input, shape index: {}]   ;;  %s540_s1 = inlined_call_operand.vmem [shape: f32[32,64], index: 1, kind: input, shape index: {}]   ;;  %s541_s2 = inlined_call_operand.vmem [shape: f32[32,64], index: 2, kind: input, shape index: {}]   ;;  %s542_s3 = inlined_call_operand.vmem [shape: f32[8,64], index: 3, kind: input, shape index: {}]   ;;  %s543_s4 = inlined_call_operand.vmem [shape: f32[8,128], index: 4, kind: output, shape index: {}]  }
   0x1 LB: > { %s506_s16 = sadd.s32 4294967295, %s469_s15   ;;  %p428_p0 = scmp.ge.s32.totalorder %s469_s15, 1  ;;  %s469_s15 = sphi %s500_s15, %s14_s15  }
   0x2   : > { %p180_p1 = scmp.lt.s32.totalorder %s469_s15, 3 }
   0x4   : > { %p181_p2 = pnand %p428_p0, %p180_p1 }
   0x5   : > { %s429_s17 = sshll.u32 (!%p181_p2), %s506_s16, 1  ;;  %p435_p4 = scmp.ne.s32.totalorder (!%p181_p2), %s506_s16, 0 }
   0x6   : > { %184 = sbr.rel (%p181_p2) target bundleno = 861 (0x35d), region = 36  ;;  %p212_p3 = scmp.lt.s32.totalorder (!%p181_p2), %s429_s17, 3 }
   0xb   : > { %s545_s17 = smov (!%p212_p3, %s429_s17), 3  ;;  %233 = sbr.rel (%p435_p4) target bundleno = 18 (0x12), region = 40 }
   0xc   : > { %s430_s18 = sshll.u32 %s545_s17, 3 }
   0xd   : > { %s215_s21 = scalar_lea.vmem %s539_s0, %s430_s18  ;;  %s221_s24 = scalar_lea.vmem %s540_s1, %s430_s18 }
   0xe   : > { %s227_s27 = scalar_lea.vmem %s541_s2, %s430_s18 }
  0x10   : > { %v471_v0 = vmov 0.0  }
  0x11   : > { %234 = vst [vmem:[#allocation2] sm:$0xff] %v471_v0 }
  0x12 PF: > { %v235_v1 = vld [vmem:[%s215_s21] sm:$0xff]  ;;  %v472_v2 = vmov 0   ;;  %v236_v3 = vld [vmem:[%s215_s21 + $0x8] sm:$0xff]  ;;  %vm256_vm0 = vcmask 523264   ;;  %v241_v12 = vlaneseq  ;;  %v473_v16 = vmov 0.0   ;;  %p437_p5 = scmp.ne.s32.totalorder %s506_s16, 1 }
  0x13   : > { %452 = vset.pattern.permute.xlu0 %v472_v2  ;;  %v237_v4 = vld [vmem:[%s221_s24] sm:$0xff]  ;;  %v238_v7 = vld [vmem:[%s221_s24 + $0x8] sm:$0xff]  ;;  %vm289_vm3 = vcmask 130048   ;;  %s474_s28 = smov (!%p437_p5), 64  }
  0x14   : > { %244 = vperm.xlu0 %452, %v235_v1   ;;  %v239_v5 = vld [vmem:[%s227_s27] sm:$0xff]  ;;  %v240_v8 = vld [vmem:[%s227_s27 + $0x8] sm:$0xff]  ;;  %v242_v14 = vand.u32 127, %v241_v12 }
  0x15   : > { %v254_v6 = vmul.f32 %v239_v5, %v237_v4  ;;  %v255_v10 = vmul.f32 %v240_v8, %v238_v7 }
  0x17   : > { %v257_v9 = vsel %vm256_vm0, %v254_v6, 0.0  ;;  %v260_v11 = vsel %vm256_vm0, %v255_v10, 0.0 }
  0x18   : > { %258 = vadd.xlane.f32.xlu1 %v257_v9  ;;  %v272_v32 = vld [vmem:[#allocation2] sm:$0xff] }
  0x1c   : > { %247 = vperm.xlu0 %452, %v236_v3  }
  0x20   : > { %261 = vadd.xlane.f32.xlu1 %v260_v11 }
  0x86   : > { %v245_v13 = vpop.permute.xlu0 %244 }
  0x87   : > { %vm249_vm1 = vcmp.eq.s32.totalorder %v245_v13, %v242_v14 }
  0x88   : > { %v251_v17 = vsel %vm249_vm1, 1.0, %v473_v16 }
  0x8b   : > { %v259_v20 = vpop.xlane.xlu1 %258 }
  0x8c   : > { %v263_v21 = vmul.f32 1.442695, %v259_v20 }
  0x8e   : > { %v248_v15 = vpop.permute.xlu0 %247  ;;  %453 = vpow2.f32 %v263_v21 }
  0x8f   : > { %vm250_vm2 = vcmp.eq.s32.totalorder %v248_v15, %v242_v14 }
  0x90   : > { %v252_v18 = vsel %vm250_vm2, 1.0, %v473_v16 }
  0x91   : > { %v253_v19 = vpack.c.bf16 %v252_v18, %v251_v17 }
  0x93   : > { %273 = vxpose.xlu2.c.b16.start.end [1/1] (short) (narrow) %v253_v19, 16  ;;  %v262_v22 = vpop.xlane.xlu1 %261 }
  0x94   : > { %v265_v23 = vmul.f32 1.442695, %v262_v22  ;;  %v454_v24 = vpop.eup %453 }
  0x95   : > { %v267_v25 = vmul.f32 %v454_v24, %v237_v4 }
  0x96   : > { %455 = vpow2.f32 %v265_v23 }
  0x97   : > { %v269_v28 = vsel %vm256_vm0, %v267_v25, %v454_v24 }
  0x9c   : > { %v456_v26 = vpop.eup %455 }
  0x9d   : > { %v268_v27 = vmul.f32 %v456_v26, %v238_v7 }
  0x9f   : > { %v270_v29 = vsel %vm256_vm0, %v268_v27, %v456_v26 }
  0xa0   : > { %v271_v30 = vpack.c.bf16 %v270_v29, %v269_v28 }
  0xa2   : > { %300 = vmatpush.bf16.msra.mxu0 %v271_v30 }
 0x134   : > { %v281_v31 = vpop.trf.xlu2 }
 0x135   : > { %436 = vmatmul.msk.bf16.vlgmr.msra.gmra.mxu0 %vm289_vm3, %v281_v31 }
 0x1b2   : > { %v302_v33 = vpop.f32.mrf.mxu0 }
 0x1b3   : > { %v306_v34 = vadd.f32 %v302_v33, %v272_v32 }
 0x1b5   : > { %307 = vst [vmem:[#allocation2] sm:$0xff] %v306_v34 }
 0x1b6   : > { %311 = sbr.rel (%p437_p5) target bundleno = 861 (0x35d), region = 44 }
 0x1ba   : > { %v304_v35 = vpop.f32.mrf.mxu0 }
 0x1bb   : > { %v365_v10 = vld [vmem:[%s542_s3] sm:$0xff] }
 0x1bc   : > { %v312_v36 = vld [vmem:[#allocation2] sm:$0xff] }
 0x1bd   : > { %v313_v37 = vmax.f32 %v312_v36, 1e-30 }
 0x1bf   : > { %315 = vrot.lane.b32.xlu0 %v313_v37, %s474_s28 }
 0x231   : > { %v316_v38 = vpop.permute.xlu0 %315 }
 0x232   : > { %457 = vrcp.f32 %v316_v38  ;;  %v329_v42 = vand.u32 2147483648, %v316_v38  ;;  %v327_v44 = vand.u32 2147483647, %v316_v38  ;;  %vm323_vm5 = vweird.f32 %v316_v38 }
 0x234   : > { %v330_v46 = vor.u32 1.1754944e-38, %v329_v42  ;;  %vm328_vm7 = vcmp.eq.f32.partialorder %v327_v44, 8.507059e+37 }
 0x238   : > { %v458_v39 = vpop.eup %457 }
 0x239   : > { %v319_v40 = vmul.f32 %v458_v39, %v316_v38  ;;  %vm324_vm4 = vweird.f32 %v458_v39 }
 0x23a   : > { %vm325_vm6 = vmor %vm323_vm5, %vm324_vm4 }
 0x23b   : > { %v320_v41 = vsub.f32 1.0, %v319_v40 }
 0x23d   : > { %v321_v43 = vmul.f32 %v458_v39, %v320_v41 }
 0x23f   : > { %v322_v45 = vadd.f32 %v458_v39, %v321_v43 }
 0x241   : > { %v326_v47 = vsel %vm325_vm6, %v458_v39, %v322_v45 }
 0x242   : > { %v331_v48 = vsel %vm328_vm7, %v330_v46, %v326_v47 }
 0x243   : > { %v332_v49 = vmul.f32 %v331_v48, %v312_v36 }
 0x245   : > { %v333_v50 = vmul.f32 %v332_v49, %v332_v49 }
 0x247   : > { %v334_v51 = vsel %vm256_vm0, %v333_v50, 0.0 }
 0x248   : > { %335 = vadd.xlane.f32.xlu0 %v334_v51 }
 0x2bb   : > { %v336_v52 = vpop.xlane.xlu0 %335 }
 0x2bc   : > { %459 = vrsqrt.f32 %v336_v52  ;;  %vm344_vm8 = vcmp.eq.f32.partialorder %v336_v52, inf  ;;  %v347_v60 = vand.u32 2147483648, %v336_v52  ;;  %vm346_vm9 = vcmp.eq.f32.partialorder %v336_v52, 0.0 }
 0x2c2   : > { %v460_v53 = vpop.eup %459 }
 0x2c3   : > { %v338_v54 = vmul.f32 %v460_v53, %v336_v52 }
 0x2c5   : > { %v339_v55 = vmul.f32 %v460_v53, %v338_v54 }
 0x2c7   : > { %v340_v56 = vmul.f32 0.5, %v339_v55 }
 0x2c9   : > { %v341_v57 = vsub.f32 1.5, %v340_v56 }
 0x2cb   : > { %v342_v58 = vmul.f32 %v460_v53, %v341_v57 }
 0x2cd   : > { %v343_v59 = vmul.f32 %v342_v58, %v336_v52 }
 0x2cf   : > { %v345_v61 = vsel %vm344_vm8, %v336_v52, %v343_v59 }
 0x2d0   : > { %v348_v62 = vsel %vm346_vm9, %v347_v60, %v345_v61 }
 0x2d1   : > { %v349_v63 = vmax.f32 %v348_v62, 1e-12 }
 0x2d3   : > { %461 = vrcp.f32 %v349_v63  ;;  %v361_v3 = vand.u32 2147483648, %v349_v63  ;;  %v359_v5 = vand.u32 2147483647, %v349_v63  ;;  %vm355_vm11 = vweird.f32 %v349_v63 }
 0x2d5   : > { %v362_v7 = vor.u32 1.1754944e-38, %v361_v3  ;;  %vm360_vm13 = vcmp.eq.f32.partialorder %v359_v5, 8.507059e+37 }
 0x2d9   : > { %v462_v0 = vpop.eup %461 }
 0x2da   : > { %v351_v1 = vmul.f32 %v462_v0, %v349_v63  ;;  %vm356_vm10 = vweird.f32 %v462_v0 }
 0x2db   : > { %vm357_vm12 = vmor %vm355_vm11, %vm356_vm10 }
 0x2dc   : > { %v352_v2 = vsub.f32 1.0, %v351_v1 }
 0x2de   : > { %v353_v4 = vmul.f32 %v462_v0, %v352_v2 }
 0x2e0   : > { %v354_v6 = vadd.f32 %v462_v0, %v353_v4 }
 0x2e2   : > { %v358_v8 = vsel %vm357_vm12, %v462_v0, %v354_v6 }
 0x2e3   : > { %v363_v9 = vsel %vm360_vm13, %v362_v7, %v358_v8 }
 0x2e4   : > { %v364_v11 = vmul.f32 %v363_v9, %v332_v49 }
 0x2e6   : > { %v366_v12 = vadd.f32 %v365_v10, %v364_v11 }
 0x2e8   : > { %368 = vrot.lane.b32.xlu1 %v366_v12, %s474_s28 }
 0x35a   : > { %v369_v13 = vpop.permute.xlu1 %368 }
 0x35b   : > { %v371_v14 = vsel %vm256_vm0, %v364_v11, %v369_v13 }
 0x35c   : > { %372 = vst [vmem:[%s543_s4] sm:$0xff] %v371_v14 }
 0x35d PF: > { %s14_s15 = sadd.s32 1, %s469_s15  }
 0x35e   : > { %p11_p6 = scmp.ge.s32.totalorder %s14_s15, 4  }
 0x360   :  { %13 = sbr.rel (!%p11_p6) target bundleno = 1 (0x1), region = 76 }

</bundles_post_ra>
